<compile_context>
chip_gen: v5e
topology: v5e:2x2
jax: 0.10.0
libtpu: 0.0.40
codegen_flags: <defaults>
</compile_context>

<pallas_src>
import numpy as np
import jax
import jax.numpy as jnp
from jax.experimental import pallas as pl
from jax.experimental.pallas import tpu as pltpu


DP = 128  # padded input-feature dim (one full lane tile)


# ----------------------------------------------------------------------------
# Pallas kernel (transposed layout: batch on lanes)
#   oT = W2^T @ concat([ gaussian(W1'^T @ xT - b^T), xT_pad ])
# ----------------------------------------------------------------------------
def extended_rbf_kernel(xpT_ref, w1T_ref, bT_ref, w2T_ref, oT_ref):
    # xpT : (DP, bm)        x^T, zero-padded features on sublanes, batch on lanes
    # w1T : (K, DP)         (W_in * gammas)^T, zero-padded columns
    # bT  : (K, 1)          (centres * gammas)^T   (lane-broadcast)
    # w2T : (D_out, K+DP)   [W_out ; M_interp_pad]^T  (fused output weights)
    # oT  : (D_out, bm)     lane-dense output slab
    xpT = xpT_ref[...]
    rT = jnp.dot(w1T_ref[...], xpT, preferred_element_type=jnp.float32) - bT_ref[...]
    # TODO(synk): RBFLayer1D / basis_func_dict source not provided; gaussian basis
    #             phi = exp(-((y - c) * gamma)^2) assumed.
    phiT = jnp.exp(-(rT * rT))                                    # (K, bm)
    featT = jnp.concatenate([phiT, xpT], axis=0)                  # (K+DP, bm)
    oT_ref[...] = jnp.dot(w2T_ref[...], featT,
                          preferred_element_type=jnp.float32)     # (D_out, bm)


def extended_rbf_forward(x, w_in, centres, gammas, w_out, m_interp, *, bm=128):
    """x:(B,D_in)  w_in:(D_in,K)  centres,gammas:(1,K)  w_out:(K,D_out)  m_interp:(D_in,D_out)."""
    B, D_in = x.shape
    K = w_in.shape[1]
    D_out = w_out.shape[1]
    assert D_in <= DP, "input_dim must fit in one padded lane tile"
    bm = min(bm, B)
    assert B % bm == 0 and (bm % 128 == 0 or bm == B), "batch tile must be lane-aligned"

    # Fold gammas into the input matmul (exact algebra):
    #   (x @ W_in - c) * g  ==  x @ (W_in * g) - c * g
    w1 = w_in * gammas                        # (D_in, K)
    b = centres * gammas                      # (1, K)

    # One-time layout plumbing in XLA: transpose + zero-pad to tile-aligned shapes.
    xpT = jnp.zeros((DP, B), x.dtype).at[:D_in, :].set(x.T)             # (DP, B)
    w1T = jnp.zeros((K, DP), w1.dtype).at[:, :D_in].set(w1.T)           # (K, DP)
    bT = b.T                                                            # (K, 1)
    m_padT = jnp.zeros((D_out, DP), w_out.dtype).at[:, :D_in].set(m_interp.T)
    w2T = jnp.concatenate([w_out.T, m_padT], axis=1)                    # (D_out, K+DP)

    outT = pl.pallas_call(
        extended_rbf_kernel,
        out_shape=jax.ShapeDtypeStruct((D_out, B), jnp.float32),
        grid_spec=pltpu.PrefetchScalarGridSpec(
            num_scalar_prefetch=0,
            grid=(B // bm,),
            in_specs=[
                pl.BlockSpec((DP, bm), lambda i: (0, i)),        # x tile (batch on lanes)
                pl.BlockSpec((K, DP), lambda i: (0, 0)),         # grid-invariant weights
                pl.BlockSpec((K, 1), lambda i: (0, 0)),
                pl.BlockSpec((D_out, K + DP), lambda i: (0, 0)),
            ],
            out_specs=pl.BlockSpec((D_out, bm), lambda i: (0, i)),
        ),
        compiler_params=pltpu.CompilerParams(
            dimension_semantics=("parallel",),   # >=2 parallel steps -> both v7x TCs
        ),
    )(xpT, w1T, bT, w2T)
    return outT.T                                                       # (B, D_out)


# ----------------------------------------------------------------------------
# Glue: parameter construction mirroring ExtendedRBF.__init__ / linear_interpolation
# ----------------------------------------------------------------------------
def build_interp_matrix(input_labels, output_labels, steps):
    """Encodes ExtendedRBF.linear_interpolation as a (D_in, steps*n_out) matrix."""
    n_out = len(output_labels)
    d_in = len(input_labels)
    x0_idxs = [input_labels.index(l + "_0") for l in output_labels if l + "_0" in input_labels]
    xf_idxs = [
        input_labels.index(l + "_f") if l + "_f" in input_labels else input_labels.index(l + "_0")
        for l in output_labels
        if l + "_0" in input_labels
    ]
    dst_idxs = sorted(x0_idxs)
    line = np.linspace(0.0, 1.0, steps)
    M = np.zeros((d_in, steps * n_out), dtype=np.float32)
    for src0, srcf, dst in zip(x0_idxs, xf_idxs, dst_idxs):
        for t in range(steps):
            M[src0, t * n_out + dst] += 1.0 - line[t]
            M[srcf, t * n_out + dst] += line[t]
    return jnp.asarray(M)


def reference_forward(x, w_in, centres, gammas, w_out, m_interp, steps, n_out):
    y = x @ w_in
    r = (y - centres) * gammas
    phi = jnp.exp(-(r * r))
    pred = phi @ w_out
    base = x @ m_interp
    return (pred + base).reshape(-1, steps, n_out)


if __name__ == "__main__":
    # Module configuration (small, consistent with ExtendedRBF.__init__)
    input_labels = ["x_0", "y_0", "x_f", "y_f"]
    output_labels = ["x", "y"]
    num_points_per_traj = 8
    num_kernels = 128

    D_in = len(input_labels)
    n_out = len(output_labels)
    D_out = n_out * num_points_per_traj          # 16
    B = 256                                      # -> 2 parallel grid steps at bm=128

    key = jax.random.PRNGKey(0)
    k_x, k_w1, k_c, k_g, k_w2 = jax.random.split(key, 5)

    x = jax.random.normal(k_x, (B, D_in), dtype=jnp.float32)
    # input_layer.weight is (K, D_in) in torch; stored transposed for y = x @ w_in
    w_in = jax.random.normal(k_w1, (D_in, num_kernels), dtype=jnp.float32) / np.sqrt(D_in)
    centres = jax.random.normal(k_c, (1, num_kernels), dtype=jnp.float32)
    gammas = jnp.abs(jax.random.normal(k_g, (1, num_kernels), dtype=jnp.float32)) + 0.5
    # linear.weight is (D_out, K) in torch; stored transposed for pred = phi @ w_out
    w_out = jax.random.normal(k_w2, (num_kernels, D_out), dtype=jnp.float32) / np.sqrt(num_kernels)
    m_interp = build_interp_matrix(input_labels, output_labels, num_points_per_traj)

    out_flat = extended_rbf_forward(x, w_in, centres, gammas, w_out, m_interp, bm=128)
    out = out_flat.reshape(-1, num_points_per_traj, n_out)   # pred_to_trajectory + base
    out = jax.block_until_ready(out)

    ref = reference_forward(x, w_in, centres, gammas, w_out, m_interp,
                            num_points_per_traj, n_out)
    np.testing.assert_allclose(np.asarray(out), np.asarray(ref), rtol=1e-5, atol=1e-5)

    print("KERNEL_OK")
</pallas_src>

<mosaic_0001>
module attributes {stable_mosaic.version = 11 : i64} {
  func.func @extended_rbf_kernel(%arg0: i32, %arg1: memref<128x128xf32, #tpu.memory_space<vmem>>, %arg2: memref<128x128xf32, #tpu.memory_space<vmem>>, %arg3: memref<128x1xf32, #tpu.memory_space<vmem>>, %arg4: memref<16x256xf32, #tpu.memory_space<vmem>>, %arg5: memref<16x128xf32, #tpu.memory_space<vmem>>) attributes {dimension_semantics = [#tpu.dimension_semantics<parallel>], iteration_bounds = array<i64: 2>, scalar_prefetch = 0 : i64, scratch_operands = 0 : i64, tpu.core_type = #tpu.core_type<tc>, window_params = [{transform_indices = @transform_0, window_bounds = array<i64: 128, 128>}, {pipeline_mode = #tpu.pipeline_mode<synchronous>, transform_indices = @transform_1, window_bounds = array<i64: 128, 128>}, {pipeline_mode = #tpu.pipeline_mode<synchronous>, transform_indices = @transform_2, window_bounds = array<i64: 128, 1>}, {pipeline_mode = #tpu.pipeline_mode<synchronous>, transform_indices = @transform_3, window_bounds = array<i64: 16, 256>}, {transform_indices = @transform_4, window_bounds = array<i64: 16, 128>}]} {
    %c0 = arith.constant 0 : index
    %c0_0 = arith.constant 0 : index
    %0 = vector.load %arg1[%c0, %c0_0] : memref<128x128xf32, #tpu.memory_space<vmem>>, vector<128x128xf32>
    %c0_1 = arith.constant 0 : index
    %c0_2 = arith.constant 0 : index
    %1 = vector.load %arg2[%c0_1, %c0_2] : memref<128x128xf32, #tpu.memory_space<vmem>>, vector<128x128xf32>
    %cst = arith.constant dense<0.000000e+00> : vector<128x128xf32>
    %2 = tpu.matmul %1, %0, %cst {dimension_numbers = #tpu.dot_dimension_numbers<[1], [0], [0], [1], [0, 0, 1, 1], [], []>} : vector<128x128xf32>, vector<128x128xf32>, vector<128x128xf32> -> vector<128x128xf32>
    %c0_3 = arith.constant 0 : index
    %c0_4 = arith.constant 0 : index
    %3 = vector.load %arg3[%c0_3, %c0_4] : memref<128x1xf32, #tpu.memory_space<vmem>>, vector<128x1xf32>
    %4 = vector.broadcast %3 : vector<128x1xf32> to vector<128x128xf32>
    %5 = arith.subf %2, %4 : vector<128x128xf32>
    %6 = arith.mulf %5, %5 : vector<128x128xf32>
    %cst_5 = arith.constant 0.000000e+00 : f32
    %7 = vector.broadcast %cst_5 : f32 to vector<128x128xf32>
    %8 = arith.subf %7, %6 : vector<128x128xf32>
    %9 = math.exp %8 : vector<128x128xf32>
    %10 = tpu.concatenate %9, %0 in 0 : vector<128x128xf32>, vector<128x128xf32> -> vector<256x128xf32>
    %c0_6 = arith.constant 0 : index
    %c0_7 = arith.constant 0 : index
    %11 = vector.load %arg4[%c0_6, %c0_7] : memref<16x256xf32, #tpu.memory_space<vmem>>, vector<16x256xf32>
    %cst_8 = arith.constant dense<0.000000e+00> : vector<16x128xf32>
    %12 = tpu.matmul %11, %10, %cst_8 {dimension_numbers = #tpu.dot_dimension_numbers<[1], [0], [0], [1], [0, 0, 1, 1], [], []>} : vector<16x256xf32>, vector<256x128xf32>, vector<16x128xf32> -> vector<16x128xf32>
    %c0_9 = arith.constant 0 : index
    %c0_10 = arith.constant 0 : index
    %13 = vector.load %arg5[%c0_9, %c0_10] : memref<16x128xf32, #tpu.memory_space<vmem>>, vector<16x128xf32>
    tpu.vector_store %arg5[%c0_9, %c0_10], %12 {strides = array<i32>} : memref<16x128xf32, #tpu.memory_space<vmem>>, vector<16x128xf32>,
    return
  }
  func.func @transform_0(%arg0: i32) -> (i32, i32) {
    %c0_i32 = arith.constant 0 : i32
    %c0_i32_0 = arith.constant 0 : i32
    return %c0_i32, %arg0 : i32, i32
  }
  func.func @transform_1(%arg0: i32) -> (i32, i32) {
    %c0_i32 = arith.constant 0 : i32
    %c0_i32_0 = arith.constant 0 : i32
    %c0_i32_1 = arith.constant 0 : i32
    return %c0_i32, %c0_i32_0 : i32, i32
  }
  func.func @transform_2(%arg0: i32) -> (i32, i32) {
    %c0_i32 = arith.constant 0 : i32
    %c0_i32_0 = arith.constant 0 : i32
    %c0_i32_1 = arith.constant 0 : i32
    return %c0_i32, %c0_i32_0 : i32, i32
  }
  func.func @transform_3(%arg0: i32) -> (i32, i32) {
    %c0_i32 = arith.constant 0 : i32
    %c0_i32_0 = arith.constant 0 : i32
    %c0_i32_1 = arith.constant 0 : i32
    return %c0_i32, %c0_i32_0 : i32, i32
  }
  func.func @transform_4(%arg0: i32) -> (i32, i32) {
    %c0_i32 = arith.constant 0 : i32
    %c0_i32_0 = arith.constant 0 : i32
    return %c0_i32, %arg0 : i32, i32
  }
}

</mosaic_0001>

<bundles_post_ra>
// kernel: tpu_custom_call.1
= control target key start
LH: loop header
LB: loop body
LE: loop exit
PB: predicated region body
PF: predicated region fallthrough
CT: control target
= control target key end

     0   :  { %9 = vsyncpa [#allocation3], 0  ;;  %s1364_s0 = inlined_call_operand.hbm [shape: f32[128,256], index: 0, kind: input, shape index: {}]   ;;  %s1365_s1 = inlined_call_operand.vmem [shape: f32[128,128], index: 1, kind: input, shape index: {}]   ;;  %s1366_s2 = inlined_call_operand.vmem [shape: f32[128,1], index: 2, kind: input, shape index: {}]   ;;  %s1367_s3 = inlined_call_operand.hbm [shape: f32[16,256], index: 3, kind: input, shape index: {}]   ;;  %s1368_s4 = inlined_call_operand.hbm [shape: f32[16,256], index: 4, kind: output, shape index: {}]  }
   0x1   :  { %11 = vsyncpa [#allocation3 + $0x1], 0 }
   0x2   :  { %12 = vsyncpa [#allocation6], 0 }
   0x3   :  { %13 = vsyncpa [#allocation4], 0 }
   0x4   :  { %15 = vsyncpa [#allocation4 + $0x1], 0  ;;  %s985_s15 = smov 0   ;;  %s987_s16 = smov 0  }
   0x5   :  { %s989_s17 = smov 0   ;;  %s991_s18 = smov 0  }
   0x6 LB: > { %s1006_s19 = sadd.s32 4294967295, %s949_s18   ;;  %s657_s20 = sadd.s32 4294967294, %s949_s18   ;;  %s949_s18 = sphi %s991_s18, %s1378_s18   ;;  %s945_s17 = sphi %s989_s17, %s1377_s17   ;;  %s941_s16 = sphi %s987_s16, %s1376_s16   ;;  %s937_s15 = sphi %s985_s15, %s1375_s15  }
   0x7   : > { %p41_p0 = scmp.ne.s32.totalorder %s941_s16, %s937_s15  ;;  %p42_p1 = scmp.eq.s32.totalorder %s1006_s19, 0 }
   0x8   : > { %p128_p2 = scmp.eq.s32.totalorder %s1006_s19, 1  ;;  %p134_p3 = scmp.eq.s32.totalorder %s657_s20, 1 }
   0x9   : > { %p1015_p4 = por %p42_p1, %p41_p0  ;;  %p658_p5 = scmp.ge.s32.totalorder %s949_s18, 1 }
   0xa   : > { %p1020_p6 = por %p134_p3, %p41_p0  ;;  %p141_p7 = scmp.lt.s32.totalorder %s949_s18, 3 }
   0xb   : > { %s158_s25 = sshll.u32 %s1367_s3, 4  ;;  %s951_s27 = smov [#allocation5]   ;;  %s159_s25 = int_to_ptr.hbm [resolvable:$true] %s158_s25 }
   0xc   : > { %p1028_p8 = pnand %p658_p5, %p141_p7  ;;  %s160_s28 = sshll.u32 %s951_s27, 4  ;;  %s161_s28 = int_to_ptr.vmem [resolvable:$true] %s160_s28 }
   0xd   : > { %s1038_s29 = sadd.s32 1, %s949_s18   ;;  %s952_s30 = smov 256  }
   0xe   : > { %p727_p9 = pneg %p1028_p8  ;;  %s953_s5 = smov 16  }
   0xf   : > { %s25_s6 = ssub.s32 %s949_s18, %s1038_s29  ;;  %s28_s7 = sadd.s32 1, %s945_s17 }
  0x10   : > { %p728_p10 = pnand %p727_p9, %p42_p1  ;;  %p26_p12 = scmp.eq.s32.totalorder %s25_s6, 0 }
  0x11   : > { %p35_p13 = scmp.ne.s32.totalorder %s945_s17, %s941_s16  ;;  %p36_p0 = scmp.eq.s32.totalorder %s949_s18, 0 }
  0x12   : > { %730 = dma.hbm_to_vmem [thread:$0]  (!%p728_p10), %s159_s25, 512, %s161_s28, [#allocation6], %s952_s30, %s952_s30, %s953_s5  }
  0x13   : > { %p740_p3 = scmp.lt.s32.totalorder %s949_s18, 2  ;;  %p37_p5 = por %p36_p0, %p35_p13 }
  0x14   : > { %s1050_s8 = scalar_select %p26_p12, %s945_s17, %s28_s7  }
  0x15   : > { %p1054_p7 = por %p128_p2, %p35_p13  ;;  %s174_s10 = sand.u32 1, %s945_s17  }
  0x16   : > { %s662_s11 = sshll.u32 %s949_s18, 3  ;;  %s661_s12 = sshll.u32 %s174_s10, 7 }
  0x17   : > { %s182_s20 = scalar_lea.hbm %s1364_s0, %s662_s11  ;;  %s178_s24 = scalar_lea.vmem [#allocation2], %s661_s12 }
  0x18   : > { %s183_s23 = sshll.u32 %s182_s20, 4  ;;  %s185_s25 = sshll.u32 %s178_s24, 4  ;;  %s184_s23 = int_to_ptr.hbm [resolvable:$true] %s183_s23  ;;  %s186_s25 = int_to_ptr.vmem [resolvable:$true] %s185_s25 }
  0x19   : > { %p1065_p9 = pnand %p740_p3, %p37_p5  ;;  %s175_s28 = scalar_lea.sflag [#allocation3], %s174_s10 }
  0x1a   : > { %s849_s5 = sshra.s32 %s184_s23, 4  ;;  %s856_s12 = scalar_lea.hbm %s1364_s0, 256  ;;  %s850_s5 = int_to_ptr.hbm [resolvable:$true] %s849_s5 }
  0x1b   : > { %s851_s6 = scalar_lea.hbm %s850_s5, 128  ;;  %p853_p10 = pneg %p1065_p9 }
  0x1c   : > { %p852_p2 = scmp.ne.s32.totalorder %s850_s5, %s851_s6  ;;  %p857_p0 = scmp.lt.s32.totalorder %s850_s5, %s1364_s0 }
  0x1d   : > { %p858_p3 = scmp.lt.s32.totalorder %s856_s12, %s851_s6 }
  0x1e   : > { %p854_p12 = pnand %p853_p10, %p852_p2 }
  0x1f   : > { %p859_p5 = por %p858_p3, %p857_p0 }
  0x20   : > { %p855_p13 = pneg %p854_p12 }
  0x22   : > { %p860_p11 = pnand %p859_p5, %p855_p13 }
  0x24   : > { %863 = shalt.err (!%p860_p11)
}
  0x25   : > { %s954_s10 = smov 128   ;;  %s955_s20 = smov 8  }
  0x26   : > { %734 = dma.hbm_to_vmem [thread:$0]  (!%p1065_p9), %s184_s23, 2048, %s186_s25, %s175_s28, %s952_s30, %s954_s10, %s955_s20  }
  0x27   : > { %197 = sbr.rel (%p1028_p8) target bundleno = 431 (0x1af), region = 36  ;;  %s1083_s24 = sand.u32 (!%p1028_p8), 1, %s941_s16  }
  0x28   : > { %s664_s5 = sshll.u32 (!%p1028_p8), %s1083_s24, 7  ;;  %s200_s6 = scalar_lea.sflag (!%p1028_p8), [#allocation3], %s1083_s24 }
  0x29   : > { %s1087_s7 = scalar_lea.vmem (!%p1028_p8), [#allocation2], %s664_s5 }
  0x2c   : > { %924 = dma.done.wait (%p1015_p4), %s200_s6, 2048  }
  0x2d   : > { %926 = vsyncadd (%p1015_p4), %s200_s6, 4294965248 }
  0x2e   : > { %928 = dma.done.wait (%p42_p1), [#allocation6], 512  }
  0x2f   : > { %930 = vsyncadd (%p42_p1), [#allocation6], 4294966784  ;;  %v956_v0 = vmov 0   ;;  %v1098_v1 = vld [vmem:[%s1087_s7 + $0x78] sm:$0xff]  ;;  %v1101_v2 = vld [vmem:[%s1087_s7 + $0x70] sm:$0xff]  ;;  %s666_s21 = sshll.u32 %s1083_s24, 4 }
  0x30   : > { %784 = vset.pattern.permute.xlu0 %v956_v0  ;;  %785 = vset.pattern.permute.xlu1 %v956_v0  ;;  %v1106_v3 = vld [vmem:[%s1087_s7 + $0x68] sm:$0xff]  ;;  %v1113_v4 = vld [vmem:[%s1087_s7 + $0x60] sm:$0xff]  ;;  %v1120_v5 = vld [vmem:[%s1087_s7 + $0x58] sm:$0xff]  ;;  %s668_s26 = sshll.u32 %s1006_s19, 3  ;;  %s233_s27 = scalar_lea.vmem [#allocation7], %s666_s21 }
  0x31   : > { %786 = vset.pattern.permute.xlu2 %v956_v0  ;;  %673 = vmatpush.msra.mxu3 %v1098_v1  ;;  %v1127_v6 = vld [vmem:[%s1087_s7 + $0x50] sm:$0xff]  ;;  %v346_v7 = vld [vmem:[%s1366_s2 + $0x78] sm:$0xff]  ;;  %v1137_v8 = vld [vmem:[%s1087_s7 + $0x48] sm:$0xff]  ;;  %s570_s25 = scalar_lea.hbm %s1368_s4, %s668_s26  ;;  %s571_s28 = sshll.u32 %s233_s27, 4  ;;  %s572_s28 = int_to_ptr.vmem [resolvable:$true] %s571_s28 }
  0x32   : > { %266 = vmatpush.msra.mxu0 %v1098_v1  ;;  %671 = vmatpush.msra.mxu1 %v1098_v1  ;;  %v1144_v9 = vld [vmem:[%s1087_s7 + $0x40] sm:$0xff]  ;;  %v1150_v10 = vld [vmem:[%s1087_s7 + $0x38] sm:$0xff]  ;;  %v1157_v11 = vld [vmem:[%s1087_s7 + $0x30] sm:$0xff]  ;;  %s573_s11 = sshll.u32 %s570_s25, 4  ;;  %s560_s12 = scalar_lea.sflag [#allocation4], %s1083_s24  ;;  %s574_s11 = int_to_ptr.hbm [resolvable:$true] %s573_s11 }
  0x33   : > { %672 = vmatpush.msra.mxu2 %v1098_v1  ;;  %676 = vmatpush.msra.mxu3 %v1101_v2  ;;  %v1164_v12 = vld [vmem:[%s1087_s7 + $0x28] sm:$0xff]  ;;  %v345_v13 = vld [vmem:[%s1366_s2 + $0x70] sm:$0xff]  ;;  %v1174_v14 = vld [vmem:[%s1087_s7 + $0x20] sm:$0xff]  ;;  %s893_s13 = sshra.s32 %s574_s11, 4  ;;  %s899_s20 = scalar_lea.hbm %s1368_s4, 32  ;;  %s894_s13 = int_to_ptr.hbm [resolvable:$true] %s893_s13 }
  0x34   : > { %267 = vmatpush.msra.mxu0 %v1101_v2  ;;  %674 = vmatpush.msra.mxu1 %v1101_v2  ;;  %v1181_v15 = vld [vmem:[%s1087_s7 + $0x18] sm:$0xff]  ;;  %v1187_v16 = vld [vmem:[%s1087_s7 + $0x10] sm:$0xff]  ;;  %v344_v17 = vld [vmem:[%s1366_s2 + $0x68] sm:$0xff]  ;;  %s895_s19 = scalar_lea.hbm %s894_s13, 16  ;;  %p900_p11 = scmp.lt.s32.totalorder %s894_s13, %s1368_s4 }
  0x35   : > { %675 = vmatpush.msra.mxu2 %v1101_v2  ;;  %679 = vmatpush.msra.mxu3 %v1106_v3  ;;  %v1197_v18 = vld [vmem:[%s1087_s7 + $0x8] sm:$0xff]  ;;  %v1204_v19 = vld [vmem:[%s1087_s7] sm:$0xff]  ;;  %v261_v20 = vld [vmem:[%s1365_s1 + $0x58] sm:$0xff]  ;;  %p896_p1 = scmp.ne.s32.totalorder %s894_s13, %s895_s19  ;;  %p901_p9 = scmp.lt.s32.totalorder %s899_s20, %s895_s19 }
  0x36   : > { %268 = vmatpush.msra.mxu0 %v1106_v3  ;;  %677 = vmatpush.msra.mxu1 %v1106_v3  ;;  %v250_v21 = vld [vmem:[%s1365_s1] sm:$0xff]  ;;  %v255_v22 = vld [vmem:[%s1365_s1 + $0x28] sm:$0xff]  ;;  %v342_v24 = vld [vmem:[%s1366_s2 + $0x58] sm:$0xff] }
  0x37   : > { %678 = vmatpush.msra.mxu2 %v1106_v3  ;;  %682 = vmatpush.msra.mxu3 %v1113_v4  ;;  %v340_v23 = vld [vmem:[%s1366_s2 + $0x48] sm:$0xff]  ;;  %v343_v25 = vld [vmem:[%s1366_s2 + $0x60] sm:$0xff]  ;;  %v256_v29 = vld [vmem:[%s1365_s1 + $0x30] sm:$0xff]  ;;  %p897_p4 = pnand %p896_p1, %p1054_p7  ;;  %p902_p2 = por %p901_p9, %p900_p11 }
  0x38   : > { %269 = vmatpush.msra.mxu0 %v1113_v4  ;;  %680 = vmatpush.msra.mxu1 %v1113_v4  ;;  %v262_v26 = vld [vmem:[%s1365_s1 + $0x60] sm:$0xff]  ;;  %v251_v27 = vld [vmem:[%s1365_s1 + $0x8] sm:$0xff]  ;;  %v337_v30 = vld [vmem:[%s1366_s2 + $0x30] sm:$0xff] }
  0x39   : > { %681 = vmatpush.msra.mxu2 %v1113_v4  ;;  %685 = vmatpush.msra.mxu3 %v1120_v5  ;;  %v259_v28 = vld [vmem:[%s1365_s1 + $0x48] sm:$0xff]  ;;  %v341_v31 = vld [vmem:[%s1366_s2 + $0x50] sm:$0xff]  ;;  %v339_v32 = vld [vmem:[%s1366_s2 + $0x40] sm:$0xff]  ;;  %p898_p8 = pneg %p897_p4 }
  0x3a   : > { %270 = vmatpush.msra.mxu0 %v1120_v5  ;;  %683 = vmatpush.msra.mxu1 %v1120_v5  ;;  %v263_v33 = vld [vmem:[%s1365_s1 + $0x68] sm:$0xff]  ;;  %v252_v34 = vld [vmem:[%s1365_s1 + $0x10] sm:$0xff]  ;;  %v257_v36 = vld [vmem:[%s1365_s1 + $0x38] sm:$0xff] }
  0x3b   : > { %684 = vmatpush.msra.mxu2 %v1120_v5  ;;  %688 = vmatpush.msra.mxu3 %v1127_v6  ;;  %v260_v35 = vld [vmem:[%s1365_s1 + $0x50] sm:$0xff]  ;;  %v334_v37 = vld [vmem:[%s1366_s2 + $0x18] sm:$0xff]  ;;  %v336_v39 = vld [vmem:[%s1366_s2 + $0x28] sm:$0xff]  ;;  %p903_p10 = pnand %p902_p2, %p898_p8 }
  0x3c   : > { %271 = vmatpush.msra.mxu0 %v1127_v6  ;;  %686 = vmatpush.msra.mxu1 %v1127_v6  ;;  %v338_v38 = vld [vmem:[%s1366_s2 + $0x38] sm:$0xff]  ;;  %v264_v40 = vld [vmem:[%s1365_s1 + $0x70] sm:$0xff]  ;;  %v258_v42 = vld [vmem:[%s1365_s1 + $0x40] sm:$0xff] }
  0x3d   : > { %424 = vperm.xlu0 %784, %v346_v7   ;;  %691 = vmatpush.msra.mxu3 %v1137_v8  ;;  %v253_v41 = vld [vmem:[%s1365_s1 + $0x18] sm:$0xff]  ;;  %v331_v43 = vld [vmem:[%s1366_s2] sm:$0xff]  ;;  %v333_v45 = vld [vmem:[%s1366_s2 + $0x10] sm:$0xff] }
  0x3e   : > { %272 = vmatpush.msra.mxu0 %v1137_v8  ;;  %689 = vmatpush.msra.mxu1 %v1137_v8  ;;  %v335_v44 = vld [vmem:[%s1366_s2 + $0x20] sm:$0xff]  ;;  %v265_v46 = vld [vmem:[%s1365_s1 + $0x78] sm:$0xff]  ;;  %v332_v48 = vld [vmem:[%s1366_s2 + $0x8] sm:$0xff] }
  0x3f   : > { %687 = vmatpush.msra.mxu2 %v1127_v6  ;;  %694 = vmatpush.msra.mxu3 %v1144_v9  ;;  %v254_v47 = vld [vmem:[%s1365_s1 + $0x20] sm:$0xff] }
  0x40   : > { %273 = vmatpush.msra.mxu0 %v1144_v9  ;;  %692 = vmatpush.msra.mxu1 %v1144_v9 }
  0x41   : > { %690 = vmatpush.msra.mxu2 %v1137_v8  ;;  %697 = vmatpush.msra.mxu3 %v1150_v10 }
  0x42   : > { %274 = vmatpush.msra.mxu0 %v1150_v10  ;;  %695 = vmatpush.msra.mxu1 %v1150_v10 }
  0x43   : > { %693 = vmatpush.msra.mxu2 %v1144_v9  ;;  %700 = vmatpush.msra.mxu3 %v1157_v11 }
  0x44   : > { %275 = vmatpush.msra.mxu0 %v1157_v11  ;;  %698 = vmatpush.msra.mxu1 %v1157_v11 }
  0x45   : > { %696 = vmatpush.msra.mxu2 %v1150_v10  ;;  %703 = vmatpush.msra.mxu3 %v1164_v12 }
  0x46   : > { %276 = vmatpush.msra.mxu0 %v1164_v12  ;;  %701 = vmatpush.msra.mxu1 %v1164_v12 }
  0x47   : > { %419 = vperm.xlu0 %784, %v345_v13   ;;  %706 = vmatpush.msra.mxu3 %v1174_v14 }
  0x48   : > { %277 = vmatpush.msra.mxu0 %v1174_v14  ;;  %704 = vmatpush.msra.mxu1 %v1174_v14 }
  0x49   : > { %699 = vmatpush.msra.mxu2 %v1157_v11  ;;  %709 = vmatpush.msra.mxu3 %v1181_v15 }
  0x4a   : > { %278 = vmatpush.msra.mxu0 %v1181_v15  ;;  %707 = vmatpush.msra.mxu1 %v1181_v15 }
  0x4b   : > { %702 = vmatpush.msra.mxu2 %v1164_v12  ;;  %712 = vmatpush.msra.mxu3 %v1187_v16 }
  0x4c   : > { %279 = vmatpush.msra.mxu0 %v1187_v16  ;;  %710 = vmatpush.msra.mxu1 %v1187_v16 }
  0x4d   : > { %414 = vperm.xlu1 %785, %v344_v17   ;;  %715 = vmatpush.msra.mxu3 %v1197_v18 }
  0x4e   : > { %280 = vmatpush.msra.mxu0 %v1197_v18  ;;  %713 = vmatpush.msra.mxu1 %v1197_v18 }
  0x4f   : > { %705 = vmatpush.msra.mxu2 %v1174_v14  ;;  %718 = vmatpush.msra.mxu3 %v1204_v19 }
  0x50   : > { %281 = vmatpush.msra.mxu0 %v1204_v19  ;;  %315 = vmatmul.f32.vlgmr.msra.gmra.mxu3 %v261_v20 }
  0x51   : > { %282 = vmatmul.f32.vlgmr.msra.gmra.mxu0 %v250_v21  ;;  %716 = vmatpush.msra.mxu1 %v1204_v19 }
  0x52   : > { %708 = vmatpush.msra.mxu2 %v1181_v15  ;;  %297 = vmatmul.f32.vlgmr.msra.gmra.mxu1 %v255_v22 }
  0x53   : > { %394 = vperm.xlu0 %784, %v340_v23   ;;  %404 = vperm.xlu2 %786, %v342_v24  }
  0x54   : > { %711 = vmatpush.msra.mxu2 %v1187_v16 }
  0x55   : > { %409 = vperm.xlu1 %785, %v343_v25  }
  0x56   : > { %714 = vmatpush.msra.mxu2 %v1197_v18 }
  0x58   : > { %717 = vmatpush.msra.mxu2 %v1204_v19  ;;  %318 = vmatmul.f32.gmra.mxu3 %v262_v26 }
  0x59   : > { %285 = vmatmul.f32.gmra.mxu0 %v251_v27  ;;  %309 = vmatmul.f32.vlgmr.msra.gmra.mxu2 %v259_v28 }
  0x5a   : > { %300 = vmatmul.f32.gmra.mxu1 %v256_v29  ;;  %534 = vmatpush.msrb.mxu2 %v1098_v1 }
  0x5b   : > { %379 = vperm.xlu0 %784, %v337_v30   ;;  %399 = vperm.xlu2 %786, %v341_v31  }
  0x5c   : > { %535 = vmatpush.msrb.mxu2 %v1101_v2 }
  0x5d   : > { %389 = vperm.xlu1 %785, %v339_v32  }
  0x5e   : > { %536 = vmatpush.msrb.mxu2 %v1106_v3 }
  0x60   : > { %321 = vmatmul.f32.gmra.mxu3 %v263_v33  ;;  %537 = vmatpush.msrb.mxu2 %v1113_v4  ;;  %v508_v33 = vld [vmem:[#allocation5 + $0x8] sm:$0xff] }
  0x61   : > { %288 = vmatmul.f32.gmra.mxu0 %v252_v34  ;;  %312 = vmatmul.f32.gmra.mxu2 %v260_v35 }
  0x62   : > { %303 = vmatmul.f32.gmra.mxu1 %v257_v36  ;;  %538 = vmatpush.msrb.mxu2 %v1120_v5 }
  0x63   : > { %364 = vperm.xlu0 %784, %v334_v37   ;;  %384 = vperm.xlu2 %786, %v338_v38  }
  0x64   : > { %539 = vmatpush.msrb.mxu2 %v1127_v6 }
  0x65   : > { %374 = vperm.xlu1 %785, %v336_v39  }
  0x66   : > { %540 = vmatpush.msrb.mxu2 %v1137_v8 }
  0x68   : > { %324 = vmatmul.f32.gmra.mxu3 %v264_v40  ;;  %541 = vmatpush.msrb.mxu2 %v1144_v9 }
  0x69   : > { %291 = vmatmul.f32.gmra.mxu0 %v253_v41 }
  0x6a   : > { %306 = vmatmul.f32.gmra.mxu1 %v258_v42  ;;  %542 = vmatpush.msrb.mxu2 %v1150_v10 }
  0x6b   : > { %349 = vperm.xlu0 %784, %v331_v43   ;;  %369 = vperm.xlu2 %786, %v335_v44  }
  0x6c   : > { %543 = vmatpush.msrb.mxu2 %v1157_v11 }
  0x6d   : > { %359 = vperm.xlu1 %785, %v333_v45  }
  0x6e   : > { %544 = vmatpush.msrb.mxu2 %v1164_v12 }
  0x70   : > { %327 = vmatmul.f32.gmra.mxu3 %v265_v46  ;;  %545 = vmatpush.msrb.mxu2 %v1174_v14 }
  0x71   : > { %294 = vmatmul.f32.gmra.mxu0 %v254_v47 }
  0x72   : > { %546 = vmatpush.msrb.mxu2 %v1181_v15 }
  0x73   : > { %354 = vperm.xlu2 %786, %v332_v48  }
  0x74   : > { %547 = vmatpush.msrb.mxu2 %v1187_v16 }
  0x76   : > { %548 = vmatpush.msrb.mxu2 %v1197_v18 }
  0x78   : > { %549 = vmatpush.msrb.mxu2 %v1204_v19 }
  0x79   : > { %550 = vmatmul.f32.vlgmr.msrb.gmra.mxu2 %v508_v33 }
  0xad   : > { %v405_v55 = vpop.permute.xlu2 %404 }
  0xaf   : > { %v425_v50 = vpop.permute.xlu0 %424 }
  0xb5   : > { %v400_v61 = vpop.permute.xlu2 %399 }
  0xb9   : > { %v420_v56 = vpop.permute.xlu0 %419 }
  0xbd   : > { %v385_v5 = vpop.permute.xlu2 %384 }
  0xbf   : > { %v415_v53 = vpop.permute.xlu1 %414 }
  0xc5   : > { %v395_v62 = vpop.permute.xlu0 %394  ;;  %v370_v27 = vpop.permute.xlu2 %369 }
  0xc7   : > { %v410_v60 = vpop.permute.xlu1 %409 }
  0xcd   : > { %v380_v8 = vpop.permute.xlu0 %379 }
  0xce   : > { %v1321_v51 = vpop.f32.mrf.mxu0 }
  0xcf   : > { %v298_v52 = vpop.f32.mrf.mxu1  ;;  %v390_v4 = vpop.permute.xlu1 %389 }
  0xd3   : > { %v316_v49 = vpop.f32.mrf.mxu3 }
  0xd4   : > { %v438_v10 = vsub.f32 %v316_v49, %v405_v55 }
  0xd5   : > { %v365_v34 = vpop.permute.xlu0 %364 }
  0xd6   : > { %v1323_v57 = vpop.f32.mrf.mxu0  ;;  %v454_v20 = vmul.f32 %v438_v10, %v438_v10 }
  0xd7   : > { %v301_v58 = vpop.f32.mrf.mxu1  ;;  %v375_v26 = vpop.permute.xlu1 %374 }
  0xd8   : > { %v470_v32 = vsub.f32 0.0, %v454_v20  ;;  %v433_v38 = vsub.f32 %v301_v58, %v380_v8  ;;  %v432_v42 = vsub.f32 %v298_v52, %v375_v26 }
  0xda   : > { %v497_v44 = vmul.f32 1.442695, %v470_v32  ;;  %v449_v47 = vmul.f32 %v433_v38, %v433_v38  ;;  %v448_v55 = vmul.f32 %v432_v42, %v432_v42 }
  0xdb   : > { %v319_v54 = vpop.f32.mrf.mxu3 }
  0xdc   : > { %v310_v63 = vpop.f32.mrf.mxu2  ;;  %v439_v7 = vsub.f32 %v319_v54, %v410_v60  ;;  %v510_v54 = vld [vmem:[#allocation5 + $0x18] sm:$0xff] }
  0xdd   : > { %v436_v23 = vsub.f32 %v310_v63, %v395_v62  ;;  %553 = vmatmul.f32.gmra.mxu2 %v510_v54  ;;  %v465_v62 = vsub.f32 0.0, %v449_v47 }
  0xde   : > { %v1325_v0 = vpop.f32.mrf.mxu0  ;;  %v455_v15 = vmul.f32 %v439_v7, %v439_v7  ;;  %v464_v7 = vsub.f32 0.0, %v448_v55 }
  0xdf   : > { %v304_v2 = vpop.f32.mrf.mxu1  ;;  %v452_v37 = vmul.f32 %v436_v23, %v436_v23 }
  0xe0   : > { %v471_v25 = vsub.f32 0.0, %v455_v15  ;;  %v434_v36 = vsub.f32 %v304_v2, %v385_v5  ;;  %v485_v15 = vmul.f32 1.442695, %v464_v7 }
  0xe1   : > { %v468_v46 = vsub.f32 0.0, %v452_v37 }
  0xe2   : > { %v499_v39 = vmul.f32 1.442695, %v471_v25  ;;  %v450_v45 = vmul.f32 %v434_v36, %v434_v36  ;;  %v509_v36 = vld [vmem:[#allocation5 + $0x10] sm:$0xff] }
  0xe3   : > { %v322_v59 = vpop.f32.mrf.mxu3  ;;  %v493_v52 = vmul.f32 1.442695, %v468_v46 }
  0xe4   : > { %v440_v6 = vsub.f32 %v322_v59, %v415_v53  ;;  %v313_v11 = vpop.f32.mrf.mxu2  ;;  %v466_v59 = vsub.f32 0.0, %v450_v45 }
  0xe5   : > { %v437_v18 = vsub.f32 %v313_v11, %v400_v61  ;;  %v355_v61 = vpop.permute.xlu2 %354 }
  0xe6   : > { %v456_v13 = vmul.f32 %v440_v6, %v440_v6  ;;  %v292_v16 = vpop.f32.mrf.mxu0  ;;  %v428_v5 = vsub.f32 %v1323_v57, %v355_v61  ;;  %v489_v8 = vmul.f32 1.442695, %v466_v59 }
  0xe7   : > { %v307_v21 = vpop.f32.mrf.mxu1  ;;  %v453_v30 = vmul.f32 %v437_v18, %v437_v18  ;;  %v430_v60 = vsub.f32 %v292_v16, %v365_v34  ;;  %v507_v34 = vld [vmem:[#allocation5] sm:$0xff] }
  0xe8   : > { %v472_v22 = vsub.f32 0.0, %v456_v13  ;;  %v435_v29 = vsub.f32 %v307_v21, %v390_v4  ;;  %v444_v57 = vmul.f32 %v428_v5, %v428_v5 }
  0xe9   : > { %v469_v41 = vsub.f32 0.0, %v453_v30 }
  0xea   : > { %v501_v35 = vmul.f32 1.442695, %v472_v22  ;;  %v451_v40 = vmul.f32 %v435_v29, %v435_v29  ;;  %v460_v22 = vsub.f32 0.0, %v444_v57 }
  0xeb   : > { %v325_v1 = vpop.f32.mrf.mxu3  ;;  %v495_v53 = vmul.f32 1.442695, %v469_v41 }
  0xec   : > { %v441_v3 = vsub.f32 %v325_v1, %v420_v56  ;;  %v467_v49 = vsub.f32 0.0, %v451_v40  ;;  %v360_v56 = vpop.permute.xlu1 %359  ;;  %v350_v1 = vpop.permute.xlu0 %349 }
  0xed   : > { %v429_v2 = vsub.f32 %v1325_v0, %v360_v56  ;;  %v427_v10 = vsub.f32 %v1321_v51, %v350_v1 }
  0xee   : > { %v457_v9 = vmul.f32 %v441_v3, %v441_v3  ;;  %v295_v43 = vpop.f32.mrf.mxu0  ;;  %v491_v3 = vmul.f32 1.442695, %v467_v49 }
  0xef   : > { %v445_v13 = vmul.f32 %v429_v2, %v429_v2  ;;  %v443_v18 = vmul.f32 %v427_v10, %v427_v10 }
  0xf0   : > { %v473_v17 = vsub.f32 0.0, %v457_v9  ;;  %v446_v9 = vmul.f32 %v430_v60, %v430_v60 }
  0xf2   : > { %v503_v28 = vmul.f32 1.442695, %v473_v17  ;;  %v462_v16 = vsub.f32 0.0, %v446_v9 }
  0xf3   : > { %v328_v12 = vpop.f32.mrf.mxu3 }
  0xf4   : > { %v442_v14 = vsub.f32 %v328_v12, %v425_v50  ;;  %v431_v50 = vsub.f32 %v295_v43, %v370_v27  ;;  %v487_v12 = vmul.f32 1.442695, %v465_v62  ;;  %v481_v21 = vmul.f32 1.442695, %v462_v16 }
  0xf5   : > { %v477_v27 = vmul.f32 1.442695, %v460_v22 }
  0xf6   : > { %v458_v19 = vmul.f32 %v442_v14, %v442_v14  ;;  %v447_v4 = vmul.f32 %v431_v50, %v431_v50 }
  0xf8   : > { %v474_v24 = vsub.f32 0.0, %v458_v19  ;;  %v463_v14 = vsub.f32 0.0, %v447_v4  ;;  %v461_v19 = vsub.f32 0.0, %v445_v13 }
  0xfa   : > { %v505_v31 = vmul.f32 1.442695, %v474_v24  ;;  %v483_v20 = vmul.f32 1.442695, %v463_v14  ;;  %v459_v24 = vsub.f32 0.0, %v443_v18 }
  0xfb   : > { %v479_v25 = vmul.f32 1.442695, %v461_v19 }
  0xfc   : > { %787 = vpow2.f32 %v505_v31  ;;  %v475_v29 = vmul.f32 1.442695, %v459_v24  ;;  %v551_v37 = vpop.f32.mrf.mxu2 }
  0xfd   : > { %789 = vpow2.f32 %v503_v28 }
  0xfe   : > { %791 = vpow2.f32 %v501_v35 }
  0xff   : > { %793 = vpow2.f32 %v499_v39 }
 0x100   : > { %795 = vpow2.f32 %v497_v44 }
 0x101   : > { %797 = vpow2.f32 %v495_v53 }
 0x102   : > { %v788_v48 = vpop.eup %787  ;;  %799 = vpow2.f32 %v493_v52 }
 0x103   : > { %511 = vmatpush.msrb.mxu1 %v788_v48  ;;  %v790_v58 = vpop.eup %789  ;;  %801 = vpow2.f32 %v491_v3 }
 0x104   : > { %v792_v63 = vpop.eup %791  ;;  %803 = vpow2.f32 %v489_v8 }
 0x105   : > { %512 = vmatpush.msrb.mxu1 %v790_v58  ;;  %v794_v6 = vpop.eup %793  ;;  %805 = vpow2.f32 %v487_v12 }
 0x106   : > { %v796_v11 = vpop.eup %795  ;;  %807 = vpow2.f32 %v485_v15 }
 0x107   : > { %513 = vmatpush.msrb.mxu1 %v792_v63  ;;  %v798_v0 = vpop.eup %797  ;;  %809 = vpow2.f32 %v483_v20 }
 0x108   : > { %v800_v17 = vpop.eup %799  ;;  %811 = vpow2.f32 %v481_v21 }
 0x109   : > { %514 = vmatpush.msrb.mxu1 %v794_v6  ;;  %v802_v51 = vpop.eup %801  ;;  %813 = vpow2.f32 %v479_v25 }
 0x10a   : > { %v804_v23 = vpop.eup %803  ;;  %815 = vpow2.f32 %v477_v27 }
 0x10b   : > { %515 = vmatpush.msrb.mxu1 %v796_v11  ;;  %v806_v26 = vpop.eup %805  ;;  %817 = vpow2.f32 %v475_v29 }
 0x10c   : > { %v808_v28 = vpop.eup %807 }
 0x10d   : > { %516 = vmatpush.msrb.mxu1 %v798_v0  ;;  %v810_v30 = vpop.eup %809 }
 0x10e   : > { %v812_v31 = vpop.eup %811 }
 0x10f   : > { %517 = vmatpush.msrb.mxu1 %v800_v17  ;;  %v814_v32 = vpop.eup %813 }
 0x110   : > { %v816_v33 = vpop.eup %815 }
 0x111   : > { %518 = vmatpush.msrb.mxu1 %v802_v51  ;;  %v818_v35 = vpop.eup %817 }
 0x113   : > { %519 = vmatpush.msrb.mxu1 %v804_v23 }
 0x115   : > { %520 = vmatpush.msrb.mxu1 %v806_v26 }
 0x117   : > { %521 = vmatpush.msrb.mxu1 %v808_v28 }
 0x119   : > { %522 = vmatpush.msrb.mxu1 %v810_v30 }
 0x11b   : > { %523 = vmatpush.msrb.mxu1 %v812_v31 }
 0x11d   : > { %524 = vmatpush.msrb.mxu1 %v814_v32 }
 0x11f   : > { %525 = vmatpush.msrb.mxu1 %v816_v33 }
 0x121   : > { %526 = vmatpush.msrb.mxu1 %v818_v35 }
 0x122   : > { %527 = vmatmul.f32.vlgmr.msrb.gmra.mxu1 %v507_v34 }
 0x12a   : > { %530 = vmatmul.f32.gmra.mxu1 %v509_v36 }
 0x160   : > { %v554_v40 = vpop.f32.mrf.mxu2 }
 0x19f   : > { %v528_v38 = vpop.f32.mrf.mxu1 }
 0x1a0   : > { %v552_v39 = vadd.f32 %v551_v37, %v528_v38 }
 0x1a2   : > { %557 = vst [vmem:[%s233_s27] sm:$0xff] %v552_v39 }
 0x1a7   : > { %v531_v41 = vpop.f32.mrf.mxu1 }
 0x1a8   : > { %v555_v42 = vadd.f32 %v554_v40, %v531_v41 }
 0x1aa   : > { %558 = vst [vmem:[%s233_s27 + $0x8] sm:$0xff] %v555_v42 }
 0x1ab   : > { %906 = shalt.err (!%p903_p10)
}
 0x1ac   : > { %s957_s24 = smov 128   ;;  %s958_s7 = smov 256  }
 0x1ad   : > { %s959_s21 = smov 8  }
 0x1ae   : > { %725 = dma.vmem_to_hbm [thread:$0]  (%p1054_p7), %s572_s28, 256, %s574_s11, %s560_s12, %s957_s24, %s958_s7, %s959_s21  }
 0x1af PF: > { %s588_s26 = sand.u32 1, %s937_s15   ;;  %p1374_p12 = scmp.ge.s32.totalorder %s949_s18, 2 }
 0x1b0   : > { %s589_s30 = scalar_lea.sflag [#allocation4], %s588_s26 }
 0x1b1   : > { %p736_p13 = pnand %p1374_p12, %p1020_p6 }
 0x1b3   : > { %p737_p0 = pneg %p736_p13 }
 0x1b5   : > { %932 = dma.done.wait (%p737_p0), %s589_s30, 256  }
 0x1b6   : > { %934 = vsyncadd (%p737_p0), %s589_s30, 4294967040  ;;  %p18_p3 = scmp.ge.s32.totalorder %s1038_s29, 4   ;;  %s1375_s15 = smov %s941_s16 }
 0x1b7   : > { %s1376_s16 = smov %s945_s17  ;;  %s1377_s17 = smov %s1050_s8 }
 0x1b8   : > { %s1378_s18 = smov %s1038_s29  ;;  %20 = sbr.rel (!%p18_p3) target bundleno = 6 (0x6), region = 85 }
 0x1bd   :  { %595 = vsyncpa [#allocation3], 1 }
 0x1be   :  { %597 = vsyncpa [#allocation3 + $0x1], 1 }
 0x1bf   :  { %598 = vsyncpa [#allocation6], 1 }
 0x1c0   :  { %599 = vsyncpa [#allocation4], 1 }
 0x1c1   :  { %601 = vsyncpa [#allocation4 + $0x1], 1 }

</bundles_post_ra>
